<compile_context>
chip_gen: v7x
topology: tpu7x:2x2x1
jax: 0.10.0
libtpu: 0.0.40
codegen_flags: <defaults>
</compile_context>

<pallas_src>
import functools

import jax
import jax.numpy as jnp
from jax.experimental import pallas as pl
from jax.experimental.pallas import tpu as pltpu

_LANE = 128


def _round_up(n, m):
    return ((n + m - 1) // m) * m


def _dqn_kernel(x_ref, w1_ref, b1_ref, w2_ref, b2_ref, w3_ref, b3_ref, o_ref):
    # Cast x to the MXU operand dtype in VMEM (no-op for the f32 path).
    x = x_ref[...].astype(w1_ref.dtype)
    # Layer 1: Linear(state_dim, H) + ReLU   (f32 accumulation on the MXU)
    h1 = jnp.dot(x, w1_ref[...], preferred_element_type=jnp.float32)
    h1 = jnp.maximum(h1 + b1_ref[...], 0.0)
    # Layer 2: Linear(H, H) + ReLU
    h2 = jnp.dot(h1.astype(w2_ref.dtype), w2_ref[...],
                 preferred_element_type=jnp.float32)
    h2 = jnp.maximum(h2 + b2_ref[...], 0.0)
    # Layer 3: Linear(H, A)  (no activation) -- narrow (A-wide) masked store.
    q = jnp.dot(h2.astype(w3_ref.dtype), w3_ref[...],
                preferred_element_type=jnp.float32) + b3_ref[...]
    o_ref[...] = q.astype(o_ref.dtype)


def prepare_dqn_params(params, *, use_bf16=True):
    """Pad hidden width to 128 lanes and cast MXU operands ONCE (not per call).

    Zero padding keeps the math exact.  Biases stay f32 (VPU epilogue)."""
    w1, b1, w2, b2, w3, b3 = (params[k] for k in ("w1", "b1", "w2", "b2", "w3", "b3"))
    state_dim, hidden = w1.shape
    action_dim = w3.shape[1]
    hid_p = _round_up(hidden, _LANE)
    dt = jnp.bfloat16 if use_bf16 else jnp.float32

    return {
        "w1": jnp.zeros((state_dim, hid_p), dt).at[:, :hidden].set(w1.astype(dt)),
        "b1": jnp.zeros((1, hid_p), jnp.float32).at[:, :hidden].set(b1.reshape(1, -1)),
        "w2": jnp.zeros((hid_p, hid_p), dt).at[:hidden, :hidden].set(w2.astype(dt)),
        "b2": jnp.zeros((1, hid_p), jnp.float32).at[:, :hidden].set(b2.reshape(1, -1)),
        "w3": jnp.zeros((hid_p, action_dim), dt).at[:hidden, :].set(w3.astype(dt)),
        "b3": b3.reshape(1, action_dim).astype(jnp.float32),
    }


@functools.partial(jax.jit, static_argnames=("block_rows",))
def dqn_forward(x, prepped, *, block_rows=1024):
    """x: (B, state_dim) f32; prepped: output of prepare_dqn_params.

    Returns (B, action_dim) f32 Q-values: relu(relu(x@W1+b1)@W2+b2)@W3+b3."""
    w1, b1, w2, b2, w3, b3 = (prepped[k] for k in ("w1", "b1", "w2", "b2", "w3", "b3"))
    B, state_dim = x.shape
    hid_p = w1.shape[1]
    action_dim = w3.shape[1]

    # Batch tile: big (per-step overhead amortized, ~85%+ of HBM roofline at
    # 512+ rows) but capped so the grid keeps >=2 steps -> both v7x
    # TensorCores get work via the "parallel" axis.  Multiple of 8 sublanes.
    tb = min(block_rows, max(_round_up(pl.cdiv(B, 2), 8), 8))
    grid = (pl.cdiv(B, tb),)

    flops = 2 * B * (state_dim * hid_p + hid_p * hid_p + hid_p * action_dim)
    bytes_accessed = (
        x.size * x.dtype.itemsize
        + B * action_dim * 4
        + sum(a.size * a.dtype.itemsize for a in (w1, b1, w2, b2, w3, b3))
    )

    def const_spec(shape):
        # Same block every grid step -> parameters stay VMEM-resident.
        return pl.BlockSpec(shape, lambda i: (0,) * len(shape))

    return pl.pallas_call(
        _dqn_kernel,
        out_shape=jax.ShapeDtypeStruct((B, action_dim), jnp.float32),
        grid=grid,
        in_specs=[
            pl.BlockSpec((tb, state_dim), lambda i: (i, 0)),   # streamed x tile
            const_spec(w1.shape), const_spec(b1.shape),
            const_spec(w2.shape), const_spec(b2.shape),
            const_spec(w3.shape), const_spec(b3.shape),
        ],
        out_specs=pl.BlockSpec((tb, action_dim), lambda i: (i, 0)),
        compiler_params=pltpu.CompilerParams(
            dimension_semantics=("parallel",),   # shard batch tiles across TCs
            vmem_limit_bytes=32 << 20,
        ),
        cost_estimate=pl.CostEstimate(
            flops=flops, transcendentals=0, bytes_accessed=bytes_accessed),
    )(x, w1, b1, w2, b2, w3, b3)


def init_dqn_params(key, state_dim, action_dim, hidden=64):
    """Xavier-uniform weights (gain=1), zero biases — matches weights_init_."""
    def xavier(k, fan_in, fan_out):
        limit = jnp.sqrt(6.0 / (fan_in + fan_out))
        return jax.random.uniform(k, (fan_in, fan_out), jnp.float32, -limit, limit)

    k1, k2, k3 = jax.random.split(key, 3)
    return {
        "w1": xavier(k1, state_dim, hidden),
        "b1": jnp.zeros((1, hidden), jnp.float32),
        "w2": xavier(k2, hidden, hidden),
        "b2": jnp.zeros((1, hidden), jnp.float32),
        "w3": xavier(k3, hidden, action_dim),
        "b3": jnp.zeros((1, action_dim), jnp.float32),
    }


def _reference(x, p):
    h = jnp.maximum(x @ p["w1"] + p["b1"], 0.0)
    h = jnp.maximum(h @ p["w2"] + p["b2"], 0.0)
    return h @ p["w3"] + p["b3"]


if __name__ == "__main__":
    key = jax.random.PRNGKey(0)
    k_param, k_x = jax.random.split(key)

    batch, state_dim, action_dim = 2, 8, 4
    params = init_dqn_params(k_param, state_dim, action_dim)
    prepped = prepare_dqn_params(params)           # pad/cast weights ONCE

    # Small (acting-style) batch: grid has a single partial tile.
    x = jax.random.normal(k_x, (batch, state_dim), jnp.float32)
    out = dqn_forward(x, prepped)
    jax.block_until_ready(out)
    ref = _reference(x, params)
    assert out.shape == (batch, action_dim)
    # bf16 MXU operands -> compare against f32 reference with a bf16 tolerance.
    assert jnp.allclose(out, ref, atol=2e-2, rtol=2e-2)

    # Larger, non-tile-multiple batch: exercises >=2 grid steps + ragged tile.
    big_x = jax.random.normal(jax.random.PRNGKey(1), (1000, state_dim), jnp.float32)
    big_out = dqn_forward(big_x, prepped)
    jax.block_until_ready(big_out)
    big_ref = _reference(big_x, params)
    assert big_out.shape == (1000, action_dim)
    assert jnp.allclose(big_out, big_ref, atol=2e-2, rtol=2e-2)

    print("KERNEL_OK")
</pallas_src>

<mosaic_0001>
module attributes {stable_mosaic.version = 11 : i64} {
  func.func @_dqn_kernel(%arg0: i32, %arg1: memref<8x8xf32, #tpu.memory_space<vmem>>, %arg2: memref<8x128xbf16, #tpu.memory_space<vmem>>, %arg3: memref<1x128xf32, #tpu.memory_space<vmem>>, %arg4: memref<128x128xbf16, #tpu.memory_space<vmem>>, %arg5: memref<1x128xf32, #tpu.memory_space<vmem>>, %arg6: memref<128x4xbf16, #tpu.memory_space<vmem>>, %arg7: memref<1x4xf32, #tpu.memory_space<vmem>>, %arg8: memref<8x4xf32, #tpu.memory_space<vmem>>) attributes {dimension_semantics = [#tpu.dimension_semantics<parallel>], iteration_bounds = array<i64: 1>, scalar_prefetch = 0 : i64, scratch_operands = 0 : i64, tpu.core_type = #tpu.core_type<tc>, window_params = [{transform_indices = @transform_0, window_bounds = array<i64: 8, 8>}, {pipeline_mode = #tpu.pipeline_mode<synchronous>, transform_indices = @transform_1, window_bounds = array<i64: 8, 128>}, {pipeline_mode = #tpu.pipeline_mode<synchronous>, transform_indices = @transform_2, window_bounds = array<i64: 1, 128>}, {pipeline_mode = #tpu.pipeline_mode<synchronous>, transform_indices = @transform_3, window_bounds = array<i64: 128, 128>}, {pipeline_mode = #tpu.pipeline_mode<synchronous>, transform_indices = @transform_4, window_bounds = array<i64: 1, 128>}, {pipeline_mode = #tpu.pipeline_mode<synchronous>, transform_indices = @transform_5, window_bounds = array<i64: 128, 4>}, {pipeline_mode = #tpu.pipeline_mode<synchronous>, transform_indices = @transform_6, window_bounds = array<i64: 1, 4>}, {transform_indices = @transform_7, window_bounds = array<i64: 8, 4>}]} {
    %c0 = arith.constant 0 : index
    %c0_0 = arith.constant 0 : index
    %0 = vector.load %arg1[%c0, %c0_0] : memref<8x8xf32, #tpu.memory_space<vmem>>, vector<8x8xf32>
    %1 = arith.truncf %0 : vector<8x8xf32> to vector<8x8xbf16>
    %c0_1 = arith.constant 0 : index
    %c0_2 = arith.constant 0 : index
    %2 = vector.load %arg2[%c0_1, %c0_2] : memref<8x128xbf16, #tpu.memory_space<vmem>>, vector<8x128xbf16>
    %cst = arith.constant dense<0.000000e+00> : vector<8x128xf32>
    %3 = tpu.matmul %1, %2, %cst {dimension_numbers = #tpu.dot_dimension_numbers<[1], [0], [0], [1], [0, 0, 1, 1], [], []>} : vector<8x8xbf16>, vector<8x128xbf16>, vector<8x128xf32> -> vector<8x128xf32>
    %c0_3 = arith.constant 0 : index
    %c0_4 = arith.constant 0 : index
    %4 = vector.load %arg3[%c0_3, %c0_4] : memref<1x128xf32, #tpu.memory_space<vmem>>, vector<1x128xf32>
    %5 = vector.broadcast %4 : vector<1x128xf32> to vector<8x128xf32>
    %6 = arith.addf %3, %5 : vector<8x128xf32>
    %cst_5 = arith.constant 0.000000e+00 : f32
    %7 = vector.broadcast %cst_5 : f32 to vector<8x128xf32>
    %8 = arith.maximumf %6, %7 : vector<8x128xf32>
    %9 = arith.truncf %8 : vector<8x128xf32> to vector<8x128xbf16>
    %c0_6 = arith.constant 0 : index
    %c0_7 = arith.constant 0 : index
    %10 = vector.load %arg4[%c0_6, %c0_7] : memref<128x128xbf16, #tpu.memory_space<vmem>>, vector<128x128xbf16>
    %cst_8 = arith.constant dense<0.000000e+00> : vector<8x128xf32>
    %11 = tpu.matmul %9, %10, %cst_8 {dimension_numbers = #tpu.dot_dimension_numbers<[1], [0], [0], [1], [0, 0, 1, 1], [], []>} : vector<8x128xbf16>, vector<128x128xbf16>, vector<8x128xf32> -> vector<8x128xf32>
    %c0_9 = arith.constant 0 : index
    %c0_10 = arith.constant 0 : index
    %12 = vector.load %arg5[%c0_9, %c0_10] : memref<1x128xf32, #tpu.memory_space<vmem>>, vector<1x128xf32>
    %13 = vector.broadcast %12 : vector<1x128xf32> to vector<8x128xf32>
    %14 = arith.addf %11, %13 : vector<8x128xf32>
    %cst_11 = arith.constant 0.000000e+00 : f32
    %15 = vector.broadcast %cst_11 : f32 to vector<8x128xf32>
    %16 = arith.maximumf %14, %15 : vector<8x128xf32>
    %17 = arith.truncf %16 : vector<8x128xf32> to vector<8x128xbf16>
    %c0_12 = arith.constant 0 : index
    %c0_13 = arith.constant 0 : index
    %18 = vector.load %arg6[%c0_12, %c0_13] : memref<128x4xbf16, #tpu.memory_space<vmem>>, vector<128x4xbf16>
    %cst_14 = arith.constant dense<0.000000e+00> : vector<8x4xf32>
    %19 = tpu.matmul %17, %18, %cst_14 {dimension_numbers = #tpu.dot_dimension_numbers<[1], [0], [0], [1], [0, 0, 1, 1], [], []>} : vector<8x128xbf16>, vector<128x4xbf16>, vector<8x4xf32> -> vector<8x4xf32>
    %c0_15 = arith.constant 0 : index
    %c0_16 = arith.constant 0 : index
    %20 = vector.load %arg7[%c0_15, %c0_16] : memref<1x4xf32, #tpu.memory_space<vmem>>, vector<1x4xf32>
    %21 = vector.broadcast %20 : vector<1x4xf32> to vector<8x4xf32>
    %22 = arith.addf %19, %21 : vector<8x4xf32>
    %c0_17 = arith.constant 0 : index
    %c0_18 = arith.constant 0 : index
    %23 = vector.load %arg8[%c0_17, %c0_18] : memref<8x4xf32, #tpu.memory_space<vmem>>, vector<8x4xf32>
    tpu.vector_store %arg8[%c0_17, %c0_18], %22 {strides = array<i32>} : memref<8x4xf32, #tpu.memory_space<vmem>>, vector<8x4xf32>,
    return
  }
  func.func @transform_0(%arg0: i32) -> (i32, i32) {
    %c0_i32 = arith.constant 0 : i32
    %c0_i32_0 = arith.constant 0 : i32
    return %arg0, %c0_i32 : i32, i32
  }
  func.func @transform_1(%arg0: i32) -> (i32, i32) {
    %c0_i32 = arith.constant 0 : i32
    %c0_i32_0 = arith.constant 0 : i32
    %c0_i32_1 = arith.constant 0 : i32
    return %c0_i32, %c0_i32_0 : i32, i32
  }
  func.func @transform_2(%arg0: i32) -> (i32, i32) {
    %c0_i32 = arith.constant 0 : i32
    %c0_i32_0 = arith.constant 0 : i32
    %c0_i32_1 = arith.constant 0 : i32
    return %c0_i32, %c0_i32_0 : i32, i32
  }
  func.func @transform_3(%arg0: i32) -> (i32, i32) {
    %c0_i32 = arith.constant 0 : i32
    %c0_i32_0 = arith.constant 0 : i32
    %c0_i32_1 = arith.constant 0 : i32
    return %c0_i32, %c0_i32_0 : i32, i32
  }
  func.func @transform_4(%arg0: i32) -> (i32, i32) {
    %c0_i32 = arith.constant 0 : i32
    %c0_i32_0 = arith.constant 0 : i32
    %c0_i32_1 = arith.constant 0 : i32
    return %c0_i32, %c0_i32_0 : i32, i32
  }
  func.func @transform_5(%arg0: i32) -> (i32, i32) {
    %c0_i32 = arith.constant 0 : i32
    %c0_i32_0 = arith.constant 0 : i32
    %c0_i32_1 = arith.constant 0 : i32
    return %c0_i32, %c0_i32_0 : i32, i32
  }
  func.func @transform_6(%arg0: i32) -> (i32, i32) {
    %c0_i32 = arith.constant 0 : i32
    %c0_i32_0 = arith.constant 0 : i32
    %c0_i32_1 = arith.constant 0 : i32
    return %c0_i32, %c0_i32_0 : i32, i32
  }
  func.func @transform_7(%arg0: i32) -> (i32, i32) {
    %c0_i32 = arith.constant 0 : i32
    %c0_i32_0 = arith.constant 0 : i32
    return %arg0, %c0_i32 : i32, i32
  }
}

</mosaic_0001>

<bundles_post_ra>
// kernel: dqn_forward.1
= control target key start
LH: loop header
LB: loop body
LE: loop exit
PB: predicated region body
PF: predicated region fallthrough
CT: control target
= control target key end

     0   :  { %12 = vsyncpa [#allocation3], 0  ;;  %vm42_vm0 = vcmask 1043456   ;;  %v461_v1 = vmov 0.0   ;;  %vm462_vm1 = vmmov 0   ;;  %vm38_vm2 = vcmask 64512   ;;  %s601_s0 = inlined_call_operand.vmem [shape: f32[2,8], index: 0, kind: input, shape index: {}]   ;;  %s602_s1 = inlined_call_operand.vmem [shape: bf16[8,128], index: 1, kind: input, shape index: {}]   ;;  %s603_s2 = inlined_call_operand.vmem [shape: f32[1,128], index: 2, kind: input, shape index: {}]   ;;  %s604_s3 = inlined_call_operand.vmem [shape: bf16[128,128], index: 3, kind: input, shape index: {}]   ;;  %s605_s4 = inlined_call_operand.vmem [shape: f32[1,128], index: 4, kind: input, shape index: {}]   ;;  %s606_s5 = inlined_call_operand.vmem [shape: bf16[128,4], index: 5, kind: input, shape index: {}]   ;;  %s607_s6 = inlined_call_operand.vmem [shape: f32[1,4], index: 6, kind: input, shape index: {}]   ;;  %s608_s7 = inlined_call_operand.hbm [shape: f32[2,4], index: 7, kind: output, shape index: {}]  }
   0x1   :  { %v30_v0 = vld [vmem:[%s602_s1] sm:$0xf]  ;;  %370 = vmatprep.subr.bf16.mxu0 %v461_v1  ;;  %376 = vmatprep.subr.bf16.mxu1 %v461_v1  ;;  %v422_v6 = vld [vmem:[%s604_s3 + $0x8] sm:$0xff]   ;;  %v423_v7 = vld [vmem:[%s604_s3 + $0x10] sm:$0xff]   ;;  %vm312_vm3 = vcmask 31744  }
   0x2   :  { %v44_v2 = vsel %vm42_vm0, %v30_v0, 0  ;;  %v28_v3 = vld [vmem:[%s601_s0] sm:$0xff]  ;;  %372 = vmatprep.mubr.msk.bf16.mxu0 %vm462_vm1, %v461_v1  ;;  %392 = vmatprep.mubr.msk.bf16.mxu1 %vm462_vm1, %v461_v1  ;;  %v424_v8 = vld [vmem:[%s604_s3 + $0x18] sm:$0xff]   ;;  %v426_v10 = vld [vmem:[%s604_s3 + $0x28] sm:$0xff]  }
   0x3   :  { %371 = vmatpush3.bf16.msra.mxu0 %v44_v2  ;;  %v29_v4 = vpack.c.bf16 %v28_v3, %v28_v3  ;;  %v421_v5 = vld [vmem:[%s604_s3] sm:$0xff]   ;;  %v427_v11 = vld [vmem:[%s604_s3 + $0x30] sm:$0xff]   ;;  %v428_v12 = vld [vmem:[%s604_s3 + $0x38] sm:$0xff]  }
   0x4   :  { %396 = vmatprep.subr.bf16.mxu0 %v461_v1  ;;  %377 = vmatpush3.bf16.msra.mxu1 %v421_v5  ;;  %v425_v9 = vld [vmem:[%s604_s3 + $0x20] sm:$0xff]   ;;  %v430_v14 = vld [vmem:[%s606_s5 + $0x8] sm:$0xff]   ;;  %v431_v15 = vld [vmem:[%s606_s5 + $0x10] sm:$0xff]  }
   0x5   :  { %378 = vmatprep.subr.bf16.mxu1 %v461_v1  ;;  %v429_v13 = vld [vmem:[%s606_s5] sm:$0xff]   ;;  %v432_v16 = vld [vmem:[%s606_s5 + $0x18] sm:$0xff]   ;;  %v434_v18 = vld [vmem:[%s606_s5 + $0x28] sm:$0xff]  }
   0x6   :  { %373 = vmatmul.mubr.msk.bf16.vlgmr.msra.gmra.mrb[0].mxu0 %vm38_vm2, %v29_v4  ;;  %v433_v17 = vld [vmem:[%s606_s5 + $0x20] sm:$0xff]   ;;  %v435_v27 = vld [vmem:[%s606_s5 + $0x30] sm:$0xff]   ;;  %v436_v28 = vld [vmem:[%s606_s5 + $0x38] sm:$0xff]  }
   0x7   :  { %412 = vmatprep.mubr.msk.bf16.mxu0 %vm462_vm1, %v461_v1  ;;  %397 = vmatpush3.bf16.msra.mxu0 %v429_v13  ;;  %v330_v19 = vld [vmem:[%s603_s2] ss:$0 sm:$0xff] }
   0x8   :  { %379 = vmatpush3.bf16.msra.mxu1 %v422_v6  ;;  %398 = vmatprep.subr.bf16.mxu0 %v461_v1  ;;  %v332_v29 = vld [vmem:[%s605_s4] ss:$0 sm:$0xff] }
   0x9   :  { %380 = vmatprep.subr.bf16.mxu1 %v461_v1  ;;  %v341_v37 = vld [vmem:[%s607_s6] ss:$0 sm:$0xff] }
   0xb   :  { %399 = vmatpush3.bf16.msra.mxu0 %v430_v14 }
   0xc   :  { %381 = vmatpush3.bf16.msra.mxu1 %v423_v7  ;;  %400 = vmatprep.subr.bf16.mxu0 %v461_v1 }
   0xd   :  { %382 = vmatprep.subr.bf16.mxu1 %v461_v1 }
   0xf   :  { %401 = vmatpush3.bf16.msra.mxu0 %v431_v15 }
  0x10   :  { %383 = vmatpush3.bf16.msra.mxu1 %v424_v8  ;;  %402 = vmatprep.subr.bf16.mxu0 %v461_v1 }
  0x11   :  { %384 = vmatprep.subr.bf16.mxu1 %v461_v1 }
  0x13   :  { %403 = vmatpush3.bf16.msra.mxu0 %v432_v16 }
  0x14   :  { %385 = vmatpush3.bf16.msra.mxu1 %v425_v9  ;;  %404 = vmatprep.subr.bf16.mxu0 %v461_v1 }
  0x15   :  { %386 = vmatprep.subr.bf16.mxu1 %v461_v1 }
  0x17   :  { %405 = vmatpush3.bf16.msra.mxu0 %v433_v17 }
  0x18   :  { %387 = vmatpush3.bf16.msra.mxu1 %v426_v10  ;;  %406 = vmatprep.subr.bf16.mxu0 %v461_v1 }
  0x19   :  { %388 = vmatprep.subr.bf16.mxu1 %v461_v1 }
  0x1b   :  { %407 = vmatpush3.bf16.msra.mxu0 %v434_v18 }
  0x1c   :  { %389 = vmatpush3.bf16.msra.mxu1 %v427_v11  ;;  %408 = vmatprep.subr.bf16.mxu0 %v461_v1 }
  0x1d   :  { %390 = vmatprep.subr.bf16.mxu1 %v461_v1 }
  0x1f   :  { %409 = vmatpush3.bf16.msra.mxu0 %v435_v27 }
  0x20   :  { %391 = vmatpush3.bf16.msra.mxu1 %v428_v12  ;;  %410 = vmatprep.subr.bf16.mxu0 %v461_v1 }
  0x23   :  { %411 = vmatpush3.bf16.msra.mxu0 %v436_v28 }
  0xd9   :  { %v80_v20 = vpop.f32.mrb[0].mxu0 }
  0xda   :  { %v81_v21 = vadd.f32 %v330_v19, %v80_v20  ;;  %v374_v22 = vpop.f32.mrb[1].mxu0 }
  0xdb   :  { %v83_v23 = vpop.f32.mrb[2].mxu0 }
  0xdc   :  { %v86_v24 = vmax.f32 %v81_v21, 0.0  ;;  %v375_v25 = vpop.f32.mrb[3].mxu0 }
  0xde   :  { %v87_v26 = vpack.c.bf16 %v86_v24, %v86_v24 }
  0xe0   :  { %393 = vmatmul.mubr.bf16.vlgmr.msra.gmra.mrb[0].mxu1 %v87_v26 }
 0x1b3   :  { %v193_v30 = vpop.f32.mrb[0].mxu1 }
 0x1b4   :  { %v194_v31 = vadd.f32 %v332_v29, %v193_v30  ;;  %v394_v32 = vpop.f32.mrb[1].mxu1 }
 0x1b5   :  { %v196_v33 = vpop.f32.mrb[2].mxu1 }
 0x1b6   :  { %v199_v34 = vmax.f32 %v194_v31, 0.0  ;;  %v395_v35 = vpop.f32.mrb[3].mxu1 }
 0x1b8   :  { %v200_v36 = vpack.c.bf16 %v199_v34, %v199_v34 }
 0x1ba   :  { %413 = vmatmul.mubr.bf16.vlgmr.msra.gmra.mrb[4].mxu0 %v200_v36 }
 0x28d   :  { %v306_v38 = vpop.f32.mrb[4].mxu0 }
 0x28e   :  { %v307_v39 = vadd.f32 %v341_v37, %v306_v38  ;;  %v414_v40 = vpop.f32.mrb[5].mxu0 }
 0x28f   :  { %v309_v41 = vpop.f32.mrb[6].mxu0 }
 0x290   :  { %313 = vst.msk [vmem:[#allocation2] sm:$0xff] %vm312_vm3, %v307_v39  ;;  %v415_v42 = vpop.f32.mrb[7].mxu0 }
 0x291   :  { %318 = vsyncadd [#allocation3], 96  ;;  %s463_s4 = smov [#allocation2]  }
 0x292   :  { %s319_s5 = sshll.u32 %s463_s4, 4  ;;  %s320_s5 = int_to_ptr.vmem [resolvable:$true] %s319_s5 }
 0x293   :  { %s437_s14 = scalar_lea.vmem %s320_s5, 32  ;;  %s441_s15 = scalar_lea.vmem %s320_s5, 128 }
 0x294   :  { %p438_p0 = scmp.ne.s32.totalorder %s320_s5, %s437_s14  ;;  %p442_p1 = scmp.lt.s32.totalorder %s320_s5, %s320_s5 }
 0x295   :  { %p443_p2 = scmp.lt.s32.totalorder %s441_s15, %s437_s14 }
 0x297   :  { %p444_p3 = por %p443_p2, %p442_p1 }
 0x299   :  { %p445_p4 = pnand %p444_p3, %p438_p0 }
 0x29b   :  { %448 = shalt.err (!%p445_p4)
}
 0x29c   :  { %s449_s17 = scalar_lea.hbm %s608_s7, 32 }
 0x29d   :  { %p450_p5 = scmp.ne.s32.totalorder %s608_s7, %s449_s17  ;;  %p453_p6 = scmp.lt.u32.totalorder %s449_s17, %s608_s7 }
 0x29f   :  { %p455_p7 = pnand %p453_p6, %p450_p5 }
 0x2a1   :  { %458 = shalt.err (!%p455_p7)
}
 0x2a2   :  { %s464_s22 = smov 32   ;;  %s465_s23 = smov 2  }
 0x2a3   :  { %325 = dma.vmem_to_hbm [thread:$0]  %s320_s5, 32, %s608_s7, [#allocation3], %s464_s22, %s464_s22, %s465_s23  }
 0x2a4   :  { %459 = dma.done.wait [#allocation3], 128  }
 0x2a5   :  { %460 = vsyncadd [#allocation3], 4294967168 }
 0x2a6   :  { %329 = vsyncpa [#allocation3], 1 }

</bundles_post_ra>
